<compile_context>
chip_gen: v7x
topology: tpu7x:2x2x1
jax: 0.10.0
libtpu: 0.0.40
codegen_flags: <defaults>
</compile_context>

<pallas_src>
import jax
import jax.numpy as jnp
from jax.experimental import pallas as pl
from jax.experimental.pallas import tpu as pltpu

# Padded sizes (lane multiples of 128; 784 is left as-is, it is a contraction dim)
D_IN = 784
H1_PAD = 256   # 200 -> 256
H2_PAD = 128   # 50  -> 128
OUT_PAD = 128  # 10  -> 128
NEG = -1e30    # padded-logit bias (kept f32) so exp() -> 0 under softmax


def mlp_kernel(x_ref, w1_ref, b1_ref, w2_ref, b2_ref, w3_ref, b3_ref, out_ref):
    # x_ref: (TB, 784) f32; weights bf16; biases f32; out bf16
    x = x_ref[...].astype(jnp.bfloat16)  # cast in-kernel; no HBM round trip
    h1 = jnp.dot(x, w1_ref[...], preferred_element_type=jnp.float32) + b1_ref[...]
    h1 = jnp.maximum(h1, 0.0).astype(jnp.bfloat16)
    h2 = jnp.dot(h1, w2_ref[...], preferred_element_type=jnp.float32) + b2_ref[...]
    h2 = jnp.maximum(h2, 0.0).astype(jnp.bfloat16)
    logits = jnp.dot(h2, w3_ref[...], preferred_element_type=jnp.float32) + b3_ref[...]
    # softmax over last axis (padded cols carry bias=-1e30 -> exp == 0)
    m = jnp.max(logits, axis=-1, keepdims=True)
    e = jnp.exp(logits - m)
    inv = pl.reciprocal(jnp.sum(e, axis=-1, keepdims=True), approx=True)
    out_ref[...] = (e * inv).astype(jnp.bfloat16)


def _round_up(n, m):
    return (n + m - 1) // m * m


def _vmem_estimate_bytes(tb_rows):
    # double-buffered x (f32) + out (bf16) tiles, plus double-buffered resident weights
    x_bytes = tb_rows * D_IN * 4
    out_bytes = tb_rows * OUT_PAD * 2
    w_bytes = (D_IN * H1_PAD + H1_PAD * H2_PAD + H2_PAD * OUT_PAD) * 2 \
        + (H1_PAD + H2_PAD + OUT_PAD) * 4
    return 2 * (x_bytes + out_bytes + w_bytes)


def net_forward(x_nchw, params, *, tb=1024):
    w1, b1, w2, b2, w3, b3 = params  # padded; weights bf16, biases f32
    B = x_nchw.shape[0]
    x = x_nchw.reshape(B, -1)  # torch.flatten(x, 1); keep original dtype (f32)

    # Batch tile: multiple of 16 (bf16 sublane tile); aim for >= 4 grid steps
    # when B allows so both v7x TensorCores get work and the DMA stays pipelined.
    TB = min(tb, max(16, _round_up(pl.cdiv(B, 4), 16)))
    B_pad = _round_up(B, TB)
    if B_pad != B:
        x = jnp.pad(x, ((0, B_pad - B), (0, 0)))

    cp_kwargs = dict(dimension_semantics=("parallel",))
    est = _vmem_estimate_bytes(TB)
    if est > 14 * 1024 * 1024:  # only needed for very large tiles (v5e default is 16 MiB)
        cp_kwargs["vmem_limit_bytes"] = est + (8 << 20)

    out = pl.pallas_call(
        mlp_kernel,
        out_shape=jax.ShapeDtypeStruct((B_pad, OUT_PAD), jnp.bfloat16),
        grid=(B_pad // TB,),
        in_specs=[
            pl.BlockSpec((TB, D_IN), lambda i: (i, 0)),        # x: streamed per batch tile (f32)
            pl.BlockSpec((D_IN, H1_PAD), lambda i: (0, 0)),    # weights/biases: VMEM-resident
            pl.BlockSpec((1, H1_PAD), lambda i: (0, 0)),
            pl.BlockSpec((H1_PAD, H2_PAD), lambda i: (0, 0)),
            pl.BlockSpec((1, H2_PAD), lambda i: (0, 0)),
            pl.BlockSpec((H2_PAD, OUT_PAD), lambda i: (0, 0)),
            pl.BlockSpec((1, OUT_PAD), lambda i: (0, 0)),
        ],
        out_specs=pl.BlockSpec((TB, OUT_PAD), lambda i: (i, 0)),
        compiler_params=pltpu.CompilerParams(**cp_kwargs),
    )(x, w1, b1, w2, b2, w3, b3)

    return out[:B, :10].astype(jnp.float32)


def init_params(key):
    # Mimic torch.nn.Linear default init: U(-1/sqrt(fan_in), 1/sqrt(fan_in)),
    # then zero-pad to lane-aligned shapes. Padded fc3 bias columns get -1e30
    # (kept f32) so the padded logits vanish under softmax.
    def linear(key, fan_in, fan_out, pad_in, pad_out, bias_pad_value=0.0):
        kw, kb = jax.random.split(key)
        bound = 1.0 / jnp.sqrt(fan_in)
        w = jax.random.uniform(kw, (fan_in, fan_out), jnp.float32, -bound, bound)
        b = jax.random.uniform(kb, (fan_out,), jnp.float32, -bound, bound)
        w_p = jnp.zeros((pad_in, pad_out), jnp.float32).at[:fan_in, :fan_out].set(w)
        b_p = jnp.full((1, pad_out), bias_pad_value, jnp.float32).at[0, :fan_out].set(b)
        return w_p.astype(jnp.bfloat16), b_p

    k1, k2, k3 = jax.random.split(key, 3)
    w1, b1 = linear(k1, 784, 200, D_IN, H1_PAD)
    w2, b2 = linear(k2, 200, 50, H1_PAD, H2_PAD)
    w3, b3 = linear(k3, 50, 10, H2_PAD, OUT_PAD, bias_pad_value=NEG)
    return (w1, b1, w2, b2, w3, b3)


def _reference_forward(x_nchw, params):
    # Pure-JAX reference using the same (padded, bf16) parameters.
    w1, b1, w2, b2, w3, b3 = params
    B = x_nchw.shape[0]
    x = x_nchw.reshape(B, -1).astype(jnp.float32)
    h1 = jnp.maximum(x @ w1[:784, :200].astype(jnp.float32) + b1[:, :200], 0.0)
    h2 = jnp.maximum(h1 @ w2[:200, :50].astype(jnp.float32) + b2[:, :50], 0.0)
    logits = h2 @ w3[:50, :10].astype(jnp.float32) + b3[:, :10]
    return jax.nn.softmax(logits, axis=1)


if __name__ == "__main__":
    key = jax.random.PRNGKey(0)
    kx, kp = jax.random.split(key)
    # MNIST-like input: batch=2, NCHW (2, 1, 28, 28) -> flattens to 784 features
    x = jax.random.normal(kx, (2, 1, 28, 28), dtype=jnp.float32)
    params = init_params(kp)

    out = net_forward(x, params)
    out = jax.block_until_ready(out)

    assert out.shape == (2, 10)
    # softmax rows sum to ~1 (loose tol: bf16 matmuls + approx reciprocal + bf16 out)
    assert jnp.allclose(jnp.sum(out, axis=1), 1.0, atol=1e-2)
    ref = _reference_forward(x, params)
    assert jnp.allclose(out, ref, atol=2e-2)
    print("KERNEL_OK")
</pallas_src>

<mosaic_0001>
module attributes {stable_mosaic.version = 11 : i64} {
  func.func @mlp_kernel(%arg0: i32, %arg1: memref<16x784xf32, #tpu.memory_space<vmem>>, %arg2: memref<784x256xbf16, #tpu.memory_space<vmem>>, %arg3: memref<1x256xf32, #tpu.memory_space<vmem>>, %arg4: memref<256x128xbf16, #tpu.memory_space<vmem>>, %arg5: memref<1x128xf32, #tpu.memory_space<vmem>>, %arg6: memref<128x128xbf16, #tpu.memory_space<vmem>>, %arg7: memref<1x128xf32, #tpu.memory_space<vmem>>, %arg8: memref<16x128xbf16, #tpu.memory_space<vmem>>) attributes {dimension_semantics = [#tpu.dimension_semantics<parallel>], iteration_bounds = array<i64: 1>, scalar_prefetch = 0 : i64, scratch_operands = 0 : i64, tpu.core_type = #tpu.core_type<tc>, window_params = [{transform_indices = @transform_0, window_bounds = array<i64: 16, 784>}, {pipeline_mode = #tpu.pipeline_mode<synchronous>, transform_indices = @transform_1, window_bounds = array<i64: 784, 256>}, {pipeline_mode = #tpu.pipeline_mode<synchronous>, transform_indices = @transform_2, window_bounds = array<i64: 1, 256>}, {pipeline_mode = #tpu.pipeline_mode<synchronous>, transform_indices = @transform_3, window_bounds = array<i64: 256, 128>}, {pipeline_mode = #tpu.pipeline_mode<synchronous>, transform_indices = @transform_4, window_bounds = array<i64: 1, 128>}, {pipeline_mode = #tpu.pipeline_mode<synchronous>, transform_indices = @transform_5, window_bounds = array<i64: 128, 128>}, {pipeline_mode = #tpu.pipeline_mode<synchronous>, transform_indices = @transform_6, window_bounds = array<i64: 1, 128>}, {transform_indices = @transform_7, window_bounds = array<i64: 16, 128>}]} {
    %c0 = arith.constant 0 : index
    %c0_0 = arith.constant 0 : index
    %0 = vector.load %arg1[%c0, %c0_0] : memref<16x784xf32, #tpu.memory_space<vmem>>, vector<16x784xf32>
    %1 = arith.truncf %0 : vector<16x784xf32> to vector<16x784xbf16>
    %c0_1 = arith.constant 0 : index
    %c0_2 = arith.constant 0 : index
    %2 = vector.load %arg2[%c0_1, %c0_2] : memref<784x256xbf16, #tpu.memory_space<vmem>>, vector<784x256xbf16>
    %cst = arith.constant dense<0.000000e+00> : vector<16x256xf32>
    %3 = tpu.matmul %1, %2, %cst {dimension_numbers = #tpu.dot_dimension_numbers<[1], [0], [0], [1], [0, 0, 1, 1], [], []>} : vector<16x784xbf16>, vector<784x256xbf16>, vector<16x256xf32> -> vector<16x256xf32>
    %c0_3 = arith.constant 0 : index
    %c0_4 = arith.constant 0 : index
    %4 = vector.load %arg3[%c0_3, %c0_4] : memref<1x256xf32, #tpu.memory_space<vmem>>, vector<1x256xf32>
    %5 = vector.broadcast %4 : vector<1x256xf32> to vector<16x256xf32>
    %6 = arith.addf %3, %5 : vector<16x256xf32>
    %cst_5 = arith.constant 0.000000e+00 : f32
    %7 = vector.broadcast %cst_5 : f32 to vector<16x256xf32>
    %8 = arith.maximumf %6, %7 : vector<16x256xf32>
    %9 = arith.truncf %8 : vector<16x256xf32> to vector<16x256xbf16>
    %c0_6 = arith.constant 0 : index
    %c0_7 = arith.constant 0 : index
    %10 = vector.load %arg4[%c0_6, %c0_7] : memref<256x128xbf16, #tpu.memory_space<vmem>>, vector<256x128xbf16>
    %cst_8 = arith.constant dense<0.000000e+00> : vector<16x128xf32>
    %11 = tpu.matmul %9, %10, %cst_8 {dimension_numbers = #tpu.dot_dimension_numbers<[1], [0], [0], [1], [0, 0, 1, 1], [], []>} : vector<16x256xbf16>, vector<256x128xbf16>, vector<16x128xf32> -> vector<16x128xf32>
    %c0_9 = arith.constant 0 : index
    %c0_10 = arith.constant 0 : index
    %12 = vector.load %arg5[%c0_9, %c0_10] : memref<1x128xf32, #tpu.memory_space<vmem>>, vector<1x128xf32>
    %13 = vector.broadcast %12 : vector<1x128xf32> to vector<16x128xf32>
    %14 = arith.addf %11, %13 : vector<16x128xf32>
    %cst_11 = arith.constant 0.000000e+00 : f32
    %15 = vector.broadcast %cst_11 : f32 to vector<16x128xf32>
    %16 = arith.maximumf %14, %15 : vector<16x128xf32>
    %17 = arith.truncf %16 : vector<16x128xf32> to vector<16x128xbf16>
    %c0_12 = arith.constant 0 : index
    %c0_13 = arith.constant 0 : index
    %18 = vector.load %arg6[%c0_12, %c0_13] : memref<128x128xbf16, #tpu.memory_space<vmem>>, vector<128x128xbf16>
    %cst_14 = arith.constant dense<0.000000e+00> : vector<16x128xf32>
    %19 = tpu.matmul %17, %18, %cst_14 {dimension_numbers = #tpu.dot_dimension_numbers<[1], [0], [0], [1], [0, 0, 1, 1], [], []>} : vector<16x128xbf16>, vector<128x128xbf16>, vector<16x128xf32> -> vector<16x128xf32>
    %c0_15 = arith.constant 0 : index
    %c0_16 = arith.constant 0 : index
    %20 = vector.load %arg7[%c0_15, %c0_16] : memref<1x128xf32, #tpu.memory_space<vmem>>, vector<1x128xf32>
    %21 = vector.broadcast %20 : vector<1x128xf32> to vector<16x128xf32>
    %22 = arith.addf %19, %21 : vector<16x128xf32>
    %cst_17 = arith.constant dense<0xFF800000> : vector<16xf32>
    %23 = vector.multi_reduction <maximumf>, %22, %cst_17 [1] : vector<16x128xf32> to vector<16xf32>
    %24 = vector.shape_cast %23 : vector<16xf32> to vector<16x1xf32>
    %25 = vector.broadcast %24 : vector<16x1xf32> to vector<16x128xf32>
    %26 = arith.subf %22, %25 : vector<16x128xf32>
    %27 = math.exp %26 : vector<16x128xf32>
    %cst_18 = arith.constant dense<0.000000e+00> : vector<16xf32>
    %28 = vector.multi_reduction <add>, %27, %cst_18 [1] : vector<16x128xf32> to vector<16xf32>
    %29 = vector.shape_cast %28 : vector<16xf32> to vector<16x1xf32>
    %30 = tpu.reciprocal %29 {approx = true} : vector<16x1xf32> -> vector<16x1xf32>
    %31 = vector.broadcast %30 : vector<16x1xf32> to vector<16x128xf32>
    %32 = arith.mulf %27, %31 : vector<16x128xf32>
    %33 = arith.truncf %32 : vector<16x128xf32> to vector<16x128xbf16>
    %c0_19 = arith.constant 0 : index
    %c0_20 = arith.constant 0 : index
    %34 = vector.load %arg8[%c0_19, %c0_20] : memref<16x128xbf16, #tpu.memory_space<vmem>>, vector<16x128xbf16>
    tpu.vector_store %arg8[%c0_19, %c0_20], %33 {strides = array<i32>} : memref<16x128xbf16, #tpu.memory_space<vmem>>, vector<16x128xbf16>,
    return
  }
  func.func @transform_0(%arg0: i32) -> (i32, i32) {
    %c0_i32 = arith.constant 0 : i32
    %c0_i32_0 = arith.constant 0 : i32
    return %arg0, %c0_i32 : i32, i32
  }
  func.func @transform_1(%arg0: i32) -> (i32, i32) {
    %c0_i32 = arith.constant 0 : i32
    %c0_i32_0 = arith.constant 0 : i32
    %c0_i32_1 = arith.constant 0 : i32
    return %c0_i32, %c0_i32_0 : i32, i32
  }
  func.func @transform_2(%arg0: i32) -> (i32, i32) {
    %c0_i32 = arith.constant 0 : i32
    %c0_i32_0 = arith.constant 0 : i32
    %c0_i32_1 = arith.constant 0 : i32
    return %c0_i32, %c0_i32_0 : i32, i32
  }
  func.func @transform_3(%arg0: i32) -> (i32, i32) {
    %c0_i32 = arith.constant 0 : i32
    %c0_i32_0 = arith.constant 0 : i32
    %c0_i32_1 = arith.constant 0 : i32
    return %c0_i32, %c0_i32_0 : i32, i32
  }
  func.func @transform_4(%arg0: i32) -> (i32, i32) {
    %c0_i32 = arith.constant 0 : i32
    %c0_i32_0 = arith.constant 0 : i32
    %c0_i32_1 = arith.constant 0 : i32
    return %c0_i32, %c0_i32_0 : i32, i32
  }
  func.func @transform_5(%arg0: i32) -> (i32, i32) {
    %c0_i32 = arith.constant 0 : i32
    %c0_i32_0 = arith.constant 0 : i32
    %c0_i32_1 = arith.constant 0 : i32
    return %c0_i32, %c0_i32_0 : i32, i32
  }
  func.func @transform_6(%arg0: i32) -> (i32, i32) {
    %c0_i32 = arith.constant 0 : i32
    %c0_i32_0 = arith.constant 0 : i32
    %c0_i32_1 = arith.constant 0 : i32
    return %c0_i32, %c0_i32_0 : i32, i32
  }
  func.func @transform_7(%arg0: i32) -> (i32, i32) {
    %c0_i32 = arith.constant 0 : i32
    %c0_i32_0 = arith.constant 0 : i32
    return %arg0, %c0_i32 : i32, i32
  }
}

</mosaic_0001>

<bundles_post_ra>
// kernel: tpu_custom_call.1
= control target key start
LH: loop header
LB: loop body
LE: loop exit
PB: predicated region body
PF: predicated region fallthrough
CT: control target
= control target key end

     0   :  { %12 = vsyncpa [#allocation3], 0  ;;  %s1868_s0 = inlined_call_operand.hbm [shape: f32[16,784], index: 0, kind: input, shape index: {}]   ;;  %s1869_s1 = inlined_call_operand.hbm [shape: bf16[784,256], index: 1, kind: input, shape index: {}]   ;;  %s1870_s2 = inlined_call_operand.vmem [shape: f32[1,256], index: 2, kind: input, shape index: {}]   ;;  %s1871_s3 = inlined_call_operand.hbm [shape: bf16[256,128], index: 3, kind: input, shape index: {}]   ;;  %s1872_s4 = inlined_call_operand.vmem [shape: f32[1,128], index: 4, kind: input, shape index: {}]   ;;  %s1873_s5 = inlined_call_operand.hbm [shape: bf16[128,128], index: 5, kind: input, shape index: {}]   ;;  %s1874_s6 = inlined_call_operand.vmem [shape: f32[1,128], index: 6, kind: input, shape index: {}]   ;;  %s1875_s7 = inlined_call_operand.hbm [shape: bf16[16,128], index: 7, kind: output, shape index: {}]  }
   0x1   :  { %13 = vsyncpa [#allocation6], 0 }
   0x2   :  { %14 = vsyncpa [#allocation9], 0 }
   0x3   :  { %15 = vsyncpa [#allocation4], 0  ;;  %s1736_s24 = smov [#allocation5]   ;;  %s1618_s28 = scalar_lea.hbm %s1869_s1, 12544 }
   0x4   :  { %s33_s25 = sshll.u32 %s1736_s24, 4  ;;  %p1619_p0 = scmp.ne.s32.totalorder %s1869_s1, %s1618_s28  ;;  %s34_s25 = int_to_ptr.vmem [resolvable:$true] %s33_s25 }
   0x5   :  { %p1622_p1 = scmp.lt.u32.totalorder %s1618_s28, %s1869_s1 }
   0x7   :  { %p1624_p2 = pnand %p1622_p1, %p1619_p0 }
   0x9   :  { %1627 = shalt.err (!%p1624_p2)
}
   0xa   :  { %s1628_s10 = scalar_lea.vmem %s34_s25, 12544  ;;  %p1633_p4 = scmp.lt.s32.totalorder %s34_s25, %s34_s25 }
   0xb   :  { %p1629_p3 = scmp.ne.s32.totalorder %s34_s25, %s1628_s10  ;;  %p1634_p5 = scmp.lt.s32.totalorder %s1628_s10, %s1628_s10 }
   0xd   :  { %p1635_p6 = por %p1634_p5, %p1633_p4 }
   0xf   :  { %p1636_p7 = pnand %p1635_p6, %p1629_p3 }
  0x11   :  { %1639 = shalt.err (!%p1636_p7)
}
  0x12   :  { %s1737_s11 = smov 128   ;;  %s1738_s12 = smov 8  }
  0x13   :  { %39 = dma.hbm_to_vmem [thread:$0]  %s1869_s1, 12544, %s34_s25, [#allocation6], %s1737_s11, %s1737_s11, %s1738_s12  }
  0x14   :  { %s1739_s15 = smov [#allocation2]   ;;  %s1640_s19 = scalar_lea.hbm %s1868_s0, 1792 }
  0x15   :  { %s21_s16 = sshll.u32 %s1739_s15, 4  ;;  %p1641_p8 = scmp.ne.s32.totalorder %s1868_s0, %s1640_s19  ;;  %s22_s16 = int_to_ptr.vmem [resolvable:$true] %s21_s16 }
  0x16   :  { %p1644_p9 = scmp.lt.u32.totalorder %s1640_s19, %s1868_s0 }
  0x18   :  { %p1646_p10 = pnand %p1644_p9, %p1641_p8 }
  0x1a   :  { %1649 = shalt.err (!%p1646_p10)
}
  0x1b   :  { %s1650_s24 = scalar_lea.vmem %s22_s16, 1792  ;;  %p1655_p12 = scmp.lt.s32.totalorder %s22_s16, %s22_s16 }
  0x1c   :  { %p1651_p11 = scmp.ne.s32.totalorder %s22_s16, %s1650_s24  ;;  %p1656_p13 = scmp.lt.s32.totalorder %s1650_s24, %s1650_s24 }
  0x1e   :  { %p1657_p0 = por %p1656_p13, %p1655_p12 }
  0x20   :  { %p1658_p1 = pnand %p1657_p0, %p1651_p11 }
  0x22   :  { %1661 = shalt.err (!%p1658_p1)
}
  0x23   :  { %s1740_s1 = smov 896   ;;  %s1741_s25 = smov 56  }
  0x24   :  { %27 = dma.hbm_to_vmem [thread:$0]  %s1868_s0, 1792, %s22_s16, [#allocation3], %s1740_s1, %s1740_s1, %s1741_s25  }
  0x25   :  { %s1742_s28 = smov [#allocation7]   ;;  %s1662_s9 = scalar_lea.hbm %s1871_s3, 2048 }
  0x26   :  { %s47_s29 = sshll.u32 %s1742_s28, 4  ;;  %p1663_p2 = scmp.ne.s32.totalorder %s1871_s3, %s1662_s9  ;;  %s48_s29 = int_to_ptr.vmem [resolvable:$true] %s47_s29 }
  0x27   :  { %p1666_p3 = scmp.lt.u32.totalorder %s1662_s9, %s1871_s3 }
  0x29   :  { %p1668_p4 = pnand %p1666_p3, %p1663_p2 }
  0x2b   :  { %1671 = shalt.err (!%p1668_p4)
}
  0x2c   :  { %s1672_s14 = scalar_lea.vmem %s48_s29, 2048  ;;  %p1677_p6 = scmp.lt.s32.totalorder %s48_s29, %s48_s29 }
  0x2d   :  { %p1673_p5 = scmp.ne.s32.totalorder %s48_s29, %s1672_s14  ;;  %p1678_p7 = scmp.lt.s32.totalorder %s1672_s14, %s1672_s14 }
  0x2f   :  { %p1679_p8 = por %p1678_p7, %p1677_p6 }
  0x31   :  { %p1680_p9 = pnand %p1679_p8, %p1673_p5 }
  0x33   :  { %1683 = shalt.err (!%p1680_p9)
}
  0x34   :  { %s1743_s0 = smov 64   ;;  %s1744_s15 = smov 4  }
  0x35   :  { %53 = dma.hbm_to_vmem [thread:$0]  %s1871_s3, 2048, %s48_s29, [#allocation6], %s1743_s0, %s1743_s0, %s1744_s15  }
  0x36   :  { %s1745_s18 = smov [#allocation8]   ;;  %s1684_s22 = scalar_lea.hbm %s1873_s5, 1024 }
  0x37   :  { %s61_s19 = sshll.u32 %s1745_s18, 4  ;;  %p1685_p10 = scmp.ne.s32.totalorder %s1873_s5, %s1684_s22  ;;  %s62_s19 = int_to_ptr.vmem [resolvable:$true] %s61_s19 }
  0x38   :  { %p1688_p11 = scmp.lt.u32.totalorder %s1684_s22, %s1873_s5 }
  0x3a   :  { %p1690_p12 = pnand %p1688_p11, %p1685_p10 }
  0x3c   :  { %1693 = shalt.err (!%p1690_p12)
}
  0x3d   :  { %s1694_s26 = scalar_lea.vmem %s62_s19, 1024  ;;  %p1699_p0 = scmp.lt.s32.totalorder %s62_s19, %s62_s19 }
  0x3e   :  { %p1695_p13 = scmp.ne.s32.totalorder %s62_s19, %s1694_s26  ;;  %p1700_p1 = scmp.lt.s32.totalorder %s1694_s26, %s1694_s26 }
  0x40   :  { %p1701_p2 = por %p1700_p1, %p1699_p0 }
  0x42   :  { %p1702_p3 = pnand %p1701_p2, %p1695_p13 }
  0x44   :  { %1705 = shalt.err (!%p1702_p3)
}
  0x45   :  { %67 = dma.hbm_to_vmem [thread:$0]  %s1873_s5, 1024, %s62_s19, [#allocation9], %s1743_s0, %s1743_s0, %s1744_s15  }
  0x46   :  { %1728 = dma.done.wait [#allocation3], 1792  }
  0x47   :  { %1729 = vsyncadd [#allocation3], 4294965504 }
  0x48   :  { %1730 = dma.done.wait [#allocation6], 14592  }
  0x49   :  { %1731 = vsyncadd [#allocation6], 4294952704 }
  0x4a   :  { %1732 = dma.done.wait [#allocation9], 1024  }
  0x4b   :  { %1733 = vsyncadd [#allocation9], 4294966272  ;;  %v1439_v0 = vld [vmem:[#allocation5 + $0x104] ss:$8 sps:$4 sm:$0xff]   ;;  %v1441_v1 = vld [vmem:[#allocation5 + $0x100] ss:$8 sps:$4 sm:$0xff]  }
  0x4c   :  { %751 = vmatprep.subr.bf16.mxu0 %v1439_v0  ;;  %v1442_v2 = vld [vmem:[#allocation5 + $0x114] ss:$8 sps:$4 sm:$0xff]   ;;  %v1444_v3 = vld [vmem:[#allocation5 + $0x110] ss:$8 sps:$4 sm:$0xff]   ;;  %v1445_v4 = vld [vmem:[#allocation5 + $0x124] ss:$8 sps:$4 sm:$0xff]  }
  0x4d   :  { %752 = vmatpush1.bf16.msra.mxu0 %v1441_v1  ;;  %v1447_v5 = vld [vmem:[#allocation5 + $0x120] ss:$8 sps:$4 sm:$0xff]   ;;  %v1448_v6 = vld [vmem:[#allocation5 + $0x134] ss:$8 sps:$4 sm:$0xff]   ;;  %v1450_v7 = vld [vmem:[#allocation5 + $0x130] ss:$8 sps:$4 sm:$0xff]  }
  0x4e   :  { %753 = vmatprep.subr.bf16.mxu0 %v1442_v2  ;;  %v1451_v8 = vld [vmem:[#allocation5 + $0x144] ss:$8 sps:$4 sm:$0xff]   ;;  %v1453_v9 = vld [vmem:[#allocation5 + $0x140] ss:$8 sps:$4 sm:$0xff]   ;;  %v1454_v10 = vld [vmem:[#allocation5 + $0x154] ss:$8 sps:$4 sm:$0xff]  }
  0x4f   :  { %v1456_v11 = vld [vmem:[#allocation5 + $0x150] ss:$8 sps:$4 sm:$0xff]   ;;  %v1457_v12 = vld [vmem:[#allocation5 + $0x164] ss:$8 sps:$4 sm:$0xff]   ;;  %v1459_v16 = vld [vmem:[#allocation5 + $0x160] ss:$8 sps:$4 sm:$0xff]  }
  0x50   :  { %v86_v13 = vld [vmem:[#allocation2 + $0x18] sm:$0xff]  ;;  %v93_v14 = vld [vmem:[#allocation2 + $0x50] sm:$0xff]  ;;  %v1460_v17 = vld [vmem:[#allocation5 + $0x174] ss:$8 sps:$4 sm:$0xff]   ;;  %vm704_vm0 = vcmask 130048   ;;  %vm1748_vm1 = vmmov 0  }
  0x51   :  { %754 = vmatpush1.bf16.msra.mxu0 %v1444_v3  ;;  %v100_v15 = vpack.c.bf16 %v93_v14, %v86_v13  ;;  %v1493_v18 = vld [vmem:[#allocation5 + $0x4] ss:$8 sps:$4 sm:$0xff]   ;;  %v1462_v19 = vld [vmem:[#allocation5 + $0x170] ss:$8 sps:$4 sm:$0xff]   ;;  %v1498_v21 = vld [vmem:[#allocation5] ss:$8 sps:$4 sm:$0xff]  }
  0x52   :  { %755 = vmatprep.subr.bf16.mxu0 %v1445_v4  ;;  %v1463_v20 = vld [vmem:[#allocation5 + $0x184] ss:$8 sps:$4 sm:$0xff]   ;;  %708 = vmatprep.subr.bf16.mxu1 %v1493_v18  ;;  %v1499_v22 = vld [vmem:[#allocation5 + $0x14] ss:$8 sps:$4 sm:$0xff]   ;;  %v1465_v23 = vld [vmem:[#allocation5 + $0x180] ss:$8 sps:$4 sm:$0xff]  }
  0x53   :  { %783 = vmatprep.mubr.bf16.mxu0 %v100_v15  ;;  %709 = vmatpush1.bf16.msra.mxu1 %v1498_v21  ;;  %v1504_v24 = vld [vmem:[#allocation5 + $0x10] ss:$8 sps:$4 sm:$0xff]   ;;  %v1505_v25 = vld [vmem:[#allocation5 + $0x24] ss:$8 sps:$4 sm:$0xff]   ;;  %v1466_v26 = vld [vmem:[#allocation5 + $0x194] ss:$8 sps:$4 sm:$0xff]  }
  0x54   :  { %710 = vmatprep.subr.bf16.mxu1 %v1499_v22  ;;  %v1510_v27 = vld [vmem:[#allocation5 + $0x20] ss:$8 sps:$4 sm:$0xff]   ;;  %v1511_v28 = vld [vmem:[#allocation5 + $0x34] ss:$8 sps:$4 sm:$0xff]   ;;  %v1468_v29 = vld [vmem:[#allocation5 + $0x190] ss:$8 sps:$4 sm:$0xff]  }
  0x55   :  { %756 = vmatpush1.bf16.msra.mxu0 %v1447_v5  ;;  %v1469_v30 = vld [vmem:[#allocation5 + $0x1a4] ss:$8 sps:$4 sm:$0xff]   ;;  %v1516_v31 = vld [vmem:[#allocation5 + $0x30] ss:$8 sps:$4 sm:$0xff]   ;;  %v1471_v33 = vld [vmem:[#allocation5 + $0x1a0] ss:$8 sps:$4 sm:$0xff]  }
  0x56   :  { %757 = vmatprep.subr.bf16.mxu0 %v1448_v6  ;;  %v1517_v32 = vld [vmem:[#allocation5 + $0x44] ss:$8 sps:$4 sm:$0xff]   ;;  %v1472_v34 = vld [vmem:[#allocation5 + $0x1b4] ss:$8 sps:$4 sm:$0xff]   ;;  %v1522_v35 = vld [vmem:[#allocation5 + $0x40] ss:$8 sps:$4 sm:$0xff]  }
  0x57   :  { %711 = vmatpush1.bf16.msra.mxu1 %v1504_v24  ;;  %v1523_v36 = vld [vmem:[#allocation5 + $0x54] ss:$8 sps:$4 sm:$0xff]   ;;  %v1474_v37 = vld [vmem:[#allocation5 + $0x1b0] ss:$8 sps:$4 sm:$0xff]   ;;  %v1475_v38 = vld [vmem:[#allocation5 + $0x1c4] ss:$8 sps:$4 sm:$0xff]  }
  0x58   :  { %712 = vmatprep.subr.bf16.mxu1 %v1505_v25  ;;  %v1528_v39 = vld [vmem:[#allocation5 + $0x50] ss:$8 sps:$4 sm:$0xff]   ;;  %v1529_v40 = vld [vmem:[#allocation5 + $0x64] ss:$8 sps:$4 sm:$0xff]   ;;  %v1477_v41 = vld [vmem:[#allocation5 + $0x1c0] ss:$8 sps:$4 sm:$0xff]  }
  0x59   :  { %758 = vmatpush1.bf16.msra.mxu0 %v1450_v7  ;;  %v1478_v42 = vld [vmem:[#allocation5 + $0x1d4] ss:$8 sps:$4 sm:$0xff]   ;;  %v1534_v43 = vld [vmem:[#allocation5 + $0x60] ss:$8 sps:$4 sm:$0xff]   ;;  %v1480_v45 = vld [vmem:[#allocation5 + $0x1d0] ss:$8 sps:$4 sm:$0xff]  }
  0x5a   :  { %759 = vmatprep.subr.bf16.mxu0 %v1451_v8  ;;  %v1535_v44 = vld [vmem:[#allocation5 + $0x74] ss:$8 sps:$4 sm:$0xff]   ;;  %v1481_v46 = vld [vmem:[#allocation5 + $0x1e4] ss:$8 sps:$4 sm:$0xff]   ;;  %v1540_v47 = vld [vmem:[#allocation5 + $0x70] ss:$8 sps:$4 sm:$0xff]  }
  0x5b   :  { %713 = vmatpush1.bf16.msra.mxu1 %v1510_v27  ;;  %v1541_v48 = vld [vmem:[#allocation5 + $0x84] ss:$8 sps:$4 sm:$0xff]   ;;  %v1483_v49 = vld [vmem:[#allocation5 + $0x1e0] ss:$8 sps:$4 sm:$0xff]   ;;  %v1484_v50 = vld [vmem:[#allocation5 + $0x1f4] ss:$8 sps:$4 sm:$0xff]  }
  0x5c   :  { %714 = vmatprep.subr.bf16.mxu1 %v1511_v28  ;;  %v1546_v51 = vld [vmem:[#allocation5 + $0x80] ss:$8 sps:$4 sm:$0xff]   ;;  %v1547_v52 = vld [vmem:[#allocation5 + $0x94] ss:$8 sps:$4 sm:$0xff]   ;;  %v1486_v53 = vld [vmem:[#allocation5 + $0x1f0] ss:$8 sps:$4 sm:$0xff]  }
  0x5d   :  { %760 = vmatpush1.bf16.msra.mxu0 %v1453_v9  ;;  %v85_v54 = vld [vmem:[#allocation2 + $0x10] sm:$0xff]  ;;  %v92_v55 = vld [vmem:[#allocation2 + $0x48] sm:$0xff]  ;;  %v95_v62 = vld [vmem:[#allocation2 + $0x60] sm:$0xff] }
  0x5e   :  { %761 = vmatprep.subr.bf16.mxu0 %v1454_v10  ;;  %v1489_v56 = vld [vmem:[#allocation5 + $0x204] ss:$8 sps:$4 sm:$0xff]   ;;  %v1552_v57 = vld [vmem:[#allocation5 + $0x90] ss:$8 sps:$4 sm:$0xff]   ;;  %v1487_v58 = vld [vmem:[#allocation5 + $0x200] ss:$8 sps:$4 sm:$0xff]   ;;  %v99_v59 = vpack.c.bf16 %v92_v55, %v85_v54 }
  0x5f   :  { %715 = vmatpush1.bf16.msra.mxu1 %v1516_v31  ;;  %v1553_v60 = vld [vmem:[#allocation5 + $0xa4] ss:$8 sps:$4 sm:$0xff]   ;;  %v88_v61 = vld [vmem:[#allocation2 + $0x28] sm:$0xff]  ;;  %v1558_v1 = vld [vmem:[#allocation5 + $0xa0] ss:$8 sps:$4 sm:$0xff]  }
  0x60   :  { %716 = vmatprep.subr.bf16.mxu1 %v1517_v32  ;;  %v1492_v63 = vld [vmem:[#allocation5 + $0x214] ss:$8 sps:$4 sm:$0xff]   ;;  %v102_v0 = vpack.c.bf16 %v95_v62, %v88_v61  ;;  %v1490_v3 = vld [vmem:[#allocation5 + $0x210] ss:$8 sps:$4 sm:$0xff]   ;;  %v1497_v4 = vld [vmem:[#allocation5 + $0x224] ss:$8 sps:$4 sm:$0xff]  }
  0x61   :  { %762 = vmatpush1.bf16.msra.mxu0 %v1456_v11  ;;  %v1559_v2 = vld [vmem:[#allocation5 + $0xb4] ss:$8 sps:$4 sm:$0xff]   ;;  %v1564_v7 = vld [vmem:[#allocation5 + $0xb0] ss:$8 sps:$4 sm:$0xff]   ;;  %v1565_v9 = vld [vmem:[#allocation5 + $0xc4] ss:$8 sps:$4 sm:$0xff]  }
  0x62   :  { %763 = vmatprep.subr.bf16.mxu0 %v1457_v12  ;;  %v84_v5 = vld [vmem:[#allocation2 + $0x8] sm:$0xff]  ;;  %v91_v6 = vld [vmem:[#allocation2 + $0x40] sm:$0xff]  ;;  %v1495_v10 = vld [vmem:[#allocation5 + $0x220] ss:$8 sps:$4 sm:$0xff]   ;;  %v1746_v61 = vmov 0  }
  0x63   :  { %717 = vmatpush1.bf16.msra.mxu1 %v1522_v35  ;;  %v98_v8 = vpack.c.bf16 %v91_v6, %v84_v5  ;;  %v1503_v11 = vld [vmem:[#allocation5 + $0x234] ss:$8 sps:$4 sm:$0xff]   ;;  %v1570_v12 = vld [vmem:[#allocation5 + $0xc0] ss:$8 sps:$4 sm:$0xff]   ;;  %v1501_v14 = vld [vmem:[#allocation5 + $0x230] ss:$8 sps:$4 sm:$0xff]  }
  0x64   :  { %718 = vmatprep.subr.bf16.mxu1 %v1523_v36  ;;  %v1571_v13 = vld [vmem:[#allocation5 + $0xd4] ss:$8 sps:$4 sm:$0xff]   ;;  %v1509_v15 = vld [vmem:[#allocation5 + $0x244] ss:$8 sps:$4 sm:$0xff]   ;;  %v1513_v22 = vld [vmem:[#allocation5 + $0x250] ss:$8 sps:$4 sm:$0xff]  }
  0x65   :  { %764 = vmatpush1.bf16.msra.mxu0 %v1459_v16  ;;  %740 = vmatprep.mubr.bf16.mxu1 %v98_v8  ;;  %v1507_v16 = vld [vmem:[#allocation5 + $0x240] ss:$8 sps:$4 sm:$0xff]   ;;  %v1515_v18 = vld [vmem:[#allocation5 + $0x254] ss:$8 sps:$4 sm:$0xff]   ;;  %v1585_v24 = vld [vmem:[#allocation5 + $0xf0] ss:$8 sps:$4 sm:$0xff]  }
  0x66   :  { %765 = vmatprep.subr.bf16.mxu0 %v1460_v17  ;;  %v1576_v17 = vld [vmem:[#allocation5 + $0xd0] ss:$8 sps:$4 sm:$0xff]   ;;  %v1583_v21 = vld [vmem:[#allocation5 + $0xf4] ss:$8 sps:$4 sm:$0xff]   ;;  %v1519_v28 = vld [vmem:[#allocation5 + $0x260] ss:$8 sps:$4 sm:$0xff]  }
  0x67   :  { %719 = vmatpush1.bf16.msra.mxu1 %v1528_v39  ;;  %v83_v25 = vld [vmem:[#allocation2] sm:$0xff]  ;;  %v1588_v32 = vld [vmem:[#allocation7 + $0x48] sm:$0xff]   ;;  %v1590_v36 = vld [vmem:[#allocation7 + $0x50] sm:$0xff]   ;;  %v1747_v8 = vmov 0.0  }
  0x68   :  { %720 = vmatprep.subr.bf16.mxu1 %v1529_v40  ;;  %v1586_v27 = vld [vmem:[#allocation7 + $0x40] sm:$0xff]   ;;  %v1589_v35 = vld [vmem:[#allocation7 + $0x8] sm:$0xff]   ;;  %v1591_v39 = vld [vmem:[#allocation7 + $0x10] sm:$0xff]  }
  0x69   :  { %766 = vmatpush1.bf16.msra.mxu0 %v1462_v19  ;;  %v1577_v19 = vld [vmem:[#allocation5 + $0xe4] ss:$8 sps:$4 sm:$0xff]   ;;  %v1587_v31 = vld [vmem:[#allocation7] sm:$0xff]  }
  0x6a   :  { %767 = vmatprep.subr.bf16.mxu0 %v1463_v20  ;;  %v1582_v20 = vld [vmem:[#allocation5 + $0xe0] ss:$8 sps:$4 sm:$0xff]   ;;  %v1575_v54 = vld [vmem:[#allocation5 + $0x2f4] ss:$8 sps:$4 sm:$0xff]   ;;  %v1573_v55 = vld [vmem:[#allocation5 + $0x2f0] ss:$8 sps:$4 sm:$0xff]  }
  0x6b   :  { %721 = vmatpush1.bf16.msra.mxu1 %v1534_v43  ;;  %v1592_v40 = vld [vmem:[#allocation7 + $0x58] sm:$0xff]   ;;  %v89_v62 = vld [vmem:[#allocation2 + $0x30] sm:$0xff] }
  0x6c   :  { %722 = vmatprep.subr.bf16.mxu1 %v1535_v44  ;;  %v1593_v43 = vld [vmem:[#allocation7 + $0x18] sm:$0xff]   ;;  %v1594_v44 = vld [vmem:[#allocation7 + $0x60] sm:$0xff]   ;;  %v1599_v5 = vld [vmem:[#allocation7 + $0x30] sm:$0xff]  }
  0x6d   :  { %768 = vmatpush1.bf16.msra.mxu0 %v1465_v23  ;;  %v1521_v23 = vld [vmem:[#allocation5 + $0x264] ss:$8 sps:$4 sm:$0xff]  }
  0x6e   :  { %769 = vmatprep.subr.bf16.mxu0 %v1466_v26  ;;  %v90_v26 = vld [vmem:[#allocation2 + $0x38] sm:$0xff] }
  0x6f   :  { %723 = vmatpush1.bf16.msra.mxu1 %v1540_v47  ;;  %v1549_v47 = vld [vmem:[#allocation5 + $0x2b0] ss:$8 sps:$4 sm:$0xff]   ;;  %v1600_v6 = vld [vmem:[#allocation7 + $0x78] sm:$0xff]  }
  0x70   :  { %724 = vmatprep.subr.bf16.mxu1 %v1541_v48  ;;  %v1557_v48 = vld [vmem:[#allocation5 + $0x2c4] ss:$8 sps:$4 sm:$0xff]  }
  0x71   :  { %770 = vmatpush1.bf16.msra.mxu0 %v1468_v29  ;;  %v1527_v29 = vld [vmem:[#allocation5 + $0x274] ss:$8 sps:$4 sm:$0xff]  }
  0x72   :  { %771 = vmatprep.subr.bf16.mxu0 %v1469_v30  ;;  %v97_v30 = vpack.c.bf16 %v90_v26, %v83_v25 }
  0x73   :  { %725 = vmatpush1.bf16.msra.mxu1 %v1546_v51  ;;  %v1561_v51 = vld [vmem:[#allocation5 + $0x2d0] ss:$8 sps:$4 sm:$0xff]  }
  0x74   :  { %726 = vmatprep.subr.bf16.mxu1 %v1547_v52  ;;  %v1569_v52 = vld [vmem:[#allocation5 + $0x2e4] ss:$8 sps:$4 sm:$0xff]  }
  0x75   :  { %772 = vmatpush1.bf16.msra.mxu0 %v1471_v33  ;;  %v1525_v33 = vld [vmem:[#allocation5 + $0x270] ss:$8 sps:$4 sm:$0xff]  }
  0x76   :  { %773 = vmatprep.subr.bf16.mxu0 %v1472_v34  ;;  %v1533_v34 = vld [vmem:[#allocation5 + $0x284] ss:$8 sps:$4 sm:$0xff]  }
  0x77   :  { %727 = vmatpush1.bf16.msra.mxu1 %v1552_v57  ;;  %v94_v57 = vld [vmem:[#allocation2 + $0x58] sm:$0xff] }
  0x78   :  { %728 = vmatprep.subr.bf16.mxu1 %v1553_v60  ;;  %v1579_v60 = vld [vmem:[#allocation5 + $0x300] ss:$8 sps:$4 sm:$0xff]  }
  0x79   :  { %774 = vmatpush1.bf16.msra.mxu0 %v1474_v37  ;;  %v1531_v37 = vld [vmem:[#allocation5 + $0x280] ss:$8 sps:$4 sm:$0xff]  }
  0x7a   :  { %775 = vmatprep.subr.bf16.mxu0 %v1475_v38  ;;  %v1539_v38 = vld [vmem:[#allocation5 + $0x294] ss:$8 sps:$4 sm:$0xff]  }
  0x7b   :  { %729 = vmatpush1.bf16.msra.mxu1 %v1558_v1  ;;  %v1595_v1 = vld [vmem:[#allocation7 + $0x20] sm:$0xff]  }
  0x7c   :  { %730 = vmatprep.subr.bf16.mxu1 %v1559_v2  ;;  %v1596_v2 = vld [vmem:[#allocation7 + $0x68] sm:$0xff]  }
  0x7d   :  { %776 = vmatpush1.bf16.msra.mxu0 %v1477_v41  ;;  %v1537_v41 = vld [vmem:[#allocation5 + $0x290] ss:$8 sps:$4 sm:$0xff]  }
  0x7e   :  { %777 = vmatprep.subr.bf16.mxu0 %v1478_v42  ;;  %v1545_v42 = vld [vmem:[#allocation5 + $0x2a4] ss:$8 sps:$4 sm:$0xff]  }
  0x7f   :  { %731 = vmatpush1.bf16.msra.mxu1 %v1564_v7  ;;  %v1601_v7 = vld [vmem:[#allocation7 + $0x38] sm:$0xff]  }
  0x80   :  { %732 = vmatprep.subr.bf16.mxu1 %v1565_v9 }
  0x81   :  { %778 = vmatpush1.bf16.msra.mxu0 %v1480_v45  ;;  %v1543_v45 = vld [vmem:[#allocation5 + $0x2a0] ss:$8 sps:$4 sm:$0xff]  }
  0x82   :  { %779 = vmatprep.subr.bf16.mxu0 %v1481_v46  ;;  %v1551_v46 = vld [vmem:[#allocation5 + $0x2b4] ss:$8 sps:$4 sm:$0xff]  }
  0x83   :  { %733 = vmatpush1.bf16.msra.mxu1 %v1570_v12 }
  0x84   :  { %734 = vmatprep.subr.bf16.mxu1 %v1571_v13  ;;  %v204_v13 = vlaneseq }
  0x85   :  { %780 = vmatpush1.bf16.msra.mxu0 %v1483_v49  ;;  %v1555_v49 = vld [vmem:[#allocation5 + $0x2c0] ss:$8 sps:$4 sm:$0xff]  }
  0x86   :  { %781 = vmatprep.subr.bf16.mxu0 %v1484_v50  ;;  %v1563_v50 = vld [vmem:[#allocation5 + $0x2d4] ss:$8 sps:$4 sm:$0xff]  }
  0x87   :  { %735 = vmatpush1.bf16.msra.mxu1 %v1576_v17 }
  0x88   :  { %736 = vmatprep.subr.bf16.mxu1 %v1577_v19 }
  0x89   :  { %782 = vmatpush1.bf16.msra.mxu0 %v1486_v53  ;;  %v1567_v53 = vld [vmem:[#allocation5 + $0x2e0] ss:$8 sps:$4 sm:$0xff]  }
  0x8a   :  { %794 = vmatprep.subr.bf16.mxu0 %v1489_v56  ;;  %v87_v56 = vld [vmem:[#allocation2 + $0x20] sm:$0xff] }
  0x8b   :  { %737 = vmatpush1.bf16.msra.mxu1 %v1582_v20 }
  0x8c   :  { %784 = vmatmul.mubr.bf16.vlgmr.msra.gmra.mrb[0].mxu0 %v99_v59  ;;  %738 = vmatprep.subr.bf16.mxu1 %v1583_v21  ;;  %v101_v59 = vpack.c.bf16 %v94_v57, %v87_v56 }
  0x8d   :  { %795 = vmatpush1.bf16.msra.mxu0 %v1487_v58  ;;  %826 = vmatprep.mubr.bf16.mxu0 %v102_v0  ;;  %v1581_v58 = vld [vmem:[#allocation5 + $0x304] ss:$8 sps:$4 sm:$0xff]  }
  0x8e   :  { %796 = vmatprep.subr.bf16.mxu0 %v1492_v63  ;;  %v96_v63 = vld [vmem:[#allocation2 + $0x68] sm:$0xff] }
  0x8f   :  { %739 = vmatpush1.bf16.msra.mxu1 %v1585_v24  ;;  %v103_v0 = vpack.c.bf16 %v96_v63, %v89_v62 }
  0x90   :  { %1358 = vmatprep.subr.bf16.mxu1 %v1586_v27 }
  0x91   :  { %797 = vmatpush1.bf16.msra.mxu0 %v1490_v3  ;;  %v1597_v3 = vld [vmem:[#allocation7 + $0x28] sm:$0xff]  }
  0x92   :  { %798 = vmatprep.subr.bf16.mxu0 %v1497_v4  ;;  %741 = vmatmul.mubr.bf16.vlgmr.msra.gmra.mrb[0].mxu1 %v97_v30  ;;  %v1598_v4 = vld [vmem:[#allocation7 + $0x70] sm:$0xff]  }
  0x93   :  { %1359 = vmatpush3.bf16.msra.mxu1 %v1587_v31 }
  0x94   :  { %1360 = vmatprep.subr.bf16.mxu1 %v1588_v32 }
  0x95   :  { %799 = vmatpush1.bf16.msra.mxu0 %v1495_v10 }
  0x96   :  { %800 = vmatprep.subr.bf16.mxu0 %v1503_v11 }
  0x97   :  { %1361 = vmatpush3.bf16.msra.mxu1 %v1589_v35 }
  0x98   :  { %1362 = vmatprep.subr.bf16.mxu1 %v1590_v36 }
  0x99   :  { %801 = vmatpush1.bf16.msra.mxu0 %v1501_v14  ;;  %v205_v14 = vshrl.u32 %v204_v13, 7 }
  0x9a   :  { %802 = vmatprep.subr.bf16.mxu0 %v1509_v15 }
  0x9b   :  { %1363 = vmatpush3.bf16.msra.mxu1 %v1591_v39  ;;  %v206_v15 = vsub.s32 0, %v205_v14  ;;  %v210_v17 = vsub.s32 1, %v205_v14  ;;  %v1603_v39 = vld [vmem:[#allocation8 + $0x8] sm:$0xff]  }
  0x9c   :  { %1364 = vmatprep.subr.bf16.mxu1 %v1592_v40  ;;  %v1604_v40 = vld [vmem:[#allocation8 + $0x10] sm:$0xff]  }
  0x9d   :  { %803 = vmatpush1.bf16.msra.mxu0 %v1507_v16  ;;  %v202_v16 = vld [vmem:[%s1870_s2] sm:$0x3] }
  0x9e   :  { %804 = vmatprep.subr.bf16.mxu0 %v1515_v18  ;;  %v207_v18 = vrot.slane %v202_v16, %v206_v15  ;;  %v211_v19 = vrot.slane %v202_v16, %v210_v17 }
  0x9f   :  { %1365 = vmatpush3.bf16.msra.mxu1 %v1593_v43  ;;  %v1607_v43 = vld [vmem:[#allocation8 + $0x28] sm:$0xff]  }
  0xa0   :  { %1366 = vmatprep.subr.bf16.mxu1 %v1594_v44  ;;  %v1608_v44 = vld [vmem:[#allocation8 + $0x30] sm:$0xff]  }
  0xa1   :  { %805 = vmatpush1.bf16.msra.mxu0 %v1513_v22 }
  0xa2   :  { %806 = vmatprep.subr.bf16.mxu0 %v1521_v23 }
  0xa3   :  { %1367 = vmatpush3.bf16.msra.mxu1 %v1595_v1 }
  0xa4   :  { %1368 = vmatprep.subr.bf16.mxu1 %v1596_v2 }
  0xa5   :  { %807 = vmatpush1.bf16.msra.mxu0 %v1519_v28 }
  0xa6   :  { %808 = vmatprep.subr.bf16.mxu0 %v1527_v29 }
  0xa7   :  { %1369 = vmatpush3.bf16.msra.mxu1 %v1597_v3 }
  0xa8   :  { %1370 = vmatprep.subr.bf16.mxu1 %v1598_v4 }
  0xa9   :  { %809 = vmatpush1.bf16.msra.mxu0 %v1525_v33 }
  0xaa   :  { %810 = vmatprep.subr.bf16.mxu0 %v1533_v34 }
  0xab   :  { %1371 = vmatpush3.bf16.msra.mxu1 %v1599_v5 }
  0xac   :  { %1372 = vmatprep.subr.bf16.mxu1 %v1600_v6 }
  0xad   :  { %811 = vmatpush1.bf16.msra.mxu0 %v1531_v37 }
  0xae   :  { %812 = vmatprep.subr.bf16.mxu0 %v1539_v38  ;;  %v1602_v38 = vld [vmem:[#allocation8] sm:$0xff]  }
  0xaf   :  { %1373 = vmatpush3.bf16.msra.mxu1 %v1601_v7 }
  0xb0   :  { %1389 = vmatprep.subr.bf16.mxu1 %v1747_v8 }
  0xb1   :  { %813 = vmatpush1.bf16.msra.mxu0 %v1537_v41  ;;  %v1605_v41 = vld [vmem:[#allocation8 + $0x18] sm:$0xff]  }
  0xb2   :  { %814 = vmatprep.subr.bf16.mxu0 %v1545_v42  ;;  %v1606_v42 = vld [vmem:[#allocation8 + $0x20] sm:$0xff]  }
  0xb5   :  { %815 = vmatpush1.bf16.msra.mxu0 %v1543_v45  ;;  %v1609_v45 = vld [vmem:[#allocation8 + $0x38] sm:$0xff]  }
  0xb6   :  { %816 = vmatprep.subr.bf16.mxu0 %v1551_v46 }
  0xb9   :  { %817 = vmatpush1.bf16.msra.mxu0 %v1549_v47  ;;  %v1323_v47 = vld [vmem:[%s1872_s4] ss:$0 sm:$0xff]  ;;  %s1749_s4 = smov [#allocation10]  }
  0xba   :  { %818 = vmatprep.subr.bf16.mxu0 %v1557_v48 }
  0xbd   :  { %819 = vmatpush1.bf16.msra.mxu0 %v1555_v49 }
  0xbe   :  { %820 = vmatprep.subr.bf16.mxu0 %v1563_v50 }
  0xc1   :  { %821 = vmatpush1.bf16.msra.mxu0 %v1561_v51 }
  0xc2   :  { %822 = vmatprep.subr.bf16.mxu0 %v1569_v52 }
  0xc5   :  { %823 = vmatpush1.bf16.msra.mxu0 %v1567_v53 }
  0xc6   :  { %824 = vmatprep.subr.bf16.mxu0 %v1575_v54 }
  0xc9   :  { %825 = vmatpush1.bf16.msra.mxu0 %v1573_v55 }
  0xca   :  { %837 = vmatprep.subr.bf16.mxu0 %v1581_v58  ;;  %v1340_v58 = vld [vmem:[%s1874_s6] ss:$0 sm:$0xff]  ;;  %s1210_s6 = sshll.u32 %s1749_s4, 4  ;;  %s1211_s6 = int_to_ptr.vmem [resolvable:$true] %s1210_s6 }
  0xcb   :  { %s1706_s9 = scalar_lea.vmem %s1211_s6, 128  ;;  %p1711_p5 = scmp.lt.s32.totalorder %s1211_s6, %s1211_s6 }
  0xcc   :  { %827 = vmatmul.mubr.bf16.vlgmr.msra.gmra.mrb[0].mxu0 %v101_v59  ;;  %p1707_p4 = scmp.ne.s32.totalorder %s1211_s6, %s1706_s9  ;;  %p1712_p6 = scmp.lt.s32.totalorder %s1706_s9, %s1706_s9 }
  0xcd   :  { %838 = vmatpush1.bf16.msra.mxu0 %v1579_v60  ;;  %869 = vmatprep.mubr.bf16.mxu0 %v1746_v61 }
  0xce   :  { %p1713_p7 = por %p1712_p6, %p1711_p5 }
  0xd0   :  { %p1714_p8 = pnand %p1713_p7, %p1707_p4 }
  0xd8   :  { %1322 = vmatmul.mubr.msk.bf16.vlgmr.msra.gmra.mrb[0].mxu0 %vm704_vm0, %v103_v0 }
 0x165   :  { %v742_v9 = vpop.f32.mrb[0].mxu1 }
 0x166   :  { %v744_v10 = vpop.f32.mrb[1].mxu1  ;;  %v743_v20 = vadd.f32 %v742_v9, %v207_v18 }
 0x167   :  { %v746_v11 = vpop.f32.mrb[2].mxu1  ;;  %v745_v21 = vadd.f32 %v744_v10, %v211_v19 }
 0x168   :  { %v748_v12 = vpop.f32.mrb[3].mxu1  ;;  %v747_v23 = vadd.f32 %v746_v11, %v207_v18 }
 0x169   :  { %v749_v26 = vadd.f32 %v748_v12, %v211_v19 }
 0x1ab   :  { %v871_v22 = vpop.f32.mrb[0].mxu0 }
 0x1ac   :  { %v1410_v24 = vadd.f32 %v871_v22, %v743_v20  ;;  %v873_v25 = vpop.f32.mrb[1].mxu0 }
 0x1ad   :  { %v1412_v27 = vadd.f32 %v873_v25, %v745_v21  ;;  %v875_v28 = vpop.f32.mrb[2].mxu0 }
 0x1ae   :  { %v1414_v29 = vadd.f32 %v875_v28, %v747_v23  ;;  %v877_v30 = vpop.f32.mrb[3].mxu0  ;;  %v880_v32 = vmax.f32 %v1410_v24, 0.0 }
 0x1af   :  { %v1416_v31 = vadd.f32 %v877_v30, %v749_v26  ;;  %v881_v34 = vmax.f32 %v1412_v27, 0.0 }
 0x1b0   :  { %v882_v33 = vmax.f32 %v1414_v29, 0.0 }
 0x1b1   :  { %v883_v35 = vmax.f32 %v1416_v31, 0.0 }
 0x1b2   :  { %v884_v36 = vpack.c.bf16 %v882_v33, %v880_v32 }
 0x1b3   :  { %v885_v37 = vpack.c.bf16 %v883_v35, %v881_v34 }
 0x1b5   :  { %1053 = vmatprep.mubr.bf16.mxu1 %v885_v37 }
 0x1b6   :  { %1054 = vmatmul.mubr.bf16.vlgmr.msra.gmra.mrb[4].mxu1 %v884_v36 }
 0x1b7   :  { %1390 = vmatpush3.bf16.msra.mxu1 %v1602_v38  ;;  %1405 = vmatprep.mubr.msk.bf16.mxu1 %vm1748_vm1, %v1747_v8 }
 0x1b8   :  { %1391 = vmatprep.subr.bf16.mxu1 %v1747_v8 }
 0x1bb   :  { %1392 = vmatpush3.bf16.msra.mxu1 %v1603_v39 }
 0x1bc   :  { %1393 = vmatprep.subr.bf16.mxu1 %v1747_v8 }
 0x1bf   :  { %1394 = vmatpush3.bf16.msra.mxu1 %v1604_v40 }
 0x1c0   :  { %1395 = vmatprep.subr.bf16.mxu1 %v1747_v8 }
 0x1c3   :  { %1396 = vmatpush3.bf16.msra.mxu1 %v1605_v41 }
 0x1c4   :  { %1397 = vmatprep.subr.bf16.mxu1 %v1747_v8 }
 0x1c7   :  { %1398 = vmatpush3.bf16.msra.mxu1 %v1606_v42 }
 0x1c8   :  { %1399 = vmatprep.subr.bf16.mxu1 %v1747_v8 }
 0x1cb   :  { %1400 = vmatpush3.bf16.msra.mxu1 %v1607_v43 }
 0x1cc   :  { %1401 = vmatprep.subr.bf16.mxu1 %v1747_v8 }
 0x1cf   :  { %1402 = vmatpush3.bf16.msra.mxu1 %v1608_v44 }
 0x1d0   :  { %1403 = vmatprep.subr.bf16.mxu1 %v1747_v8 }
 0x1d3   :  { %1404 = vmatpush3.bf16.msra.mxu1 %v1609_v45 }
 0x289   :  { %v1374_v46 = vpop.f32.mrb[4].mxu1 }
 0x28a   :  { %v1375_v48 = vpop.f32.mrb[5].mxu1 }
 0x28b   :  { %v1376_v49 = vadd.f32 %v1375_v48, %v1374_v46  ;;  %v1377_v50 = vpop.f32.mrb[6].mxu1 }
 0x28c   :  { %v1378_v51 = vpop.f32.mrb[7].mxu1 }
 0x28d   :  { %v1056_v52 = vadd.f32 %v1376_v49, %v1323_v47  ;;  %v1379_v53 = vadd.f32 %v1378_v51, %v1377_v50 }
 0x28f   :  { %v1059_v54 = vadd.f32 %v1379_v53, %v1323_v47  ;;  %v1062_v55 = vmax.f32 %v1056_v52, 0.0 }
 0x291   :  { %v1063_v56 = vmax.f32 %v1059_v54, 0.0 }
 0x293   :  { %v1064_v57 = vpack.c.bf16 %v1063_v56, %v1062_v55 }
 0x295   :  { %1406 = vmatmul.mubr.bf16.vlgmr.msra.gmra.mrb[8].mxu1 %v1064_v57 }
 0x368   :  { %v1170_v59 = vpop.f32.mrb[8].mxu1 }
 0x369   :  { %v1171_v60 = vadd.f32 %v1340_v58, %v1170_v59  ;;  %v1407_v61 = vpop.f32.mrb[9].mxu1 }
 0x36a   :  { %v1173_v62 = vpop.f32.mrb[10].mxu1 }
 0x36b   :  { %1177 = vmax.xlane.f32.xlu0 %v1171_v60  ;;  %v1408_v63 = vpop.f32.mrb[11].mxu1  ;;  %v1174_v0 = vadd.f32 %v1340_v58, %v1173_v62 }
 0x36f   :  { %1179 = vmax.xlane.f32.xlu0 %v1174_v0 }
 0x3f8   :  { %v1178_v1 = vpop.xlane.xlu0 %1177 }
 0x3f9   :  { %v1181_v2 = vsub.f32 %v1171_v60, %v1178_v1 }
 0x3fb   :  { %v1183_v3 = vmul.f32 1.442695, %v1181_v2 }
 0x3fc   :  { %v1180_v4 = vpop.xlane.xlu0 %1179 }
 0x3fd   :  { %1610 = vpow2.f32 %v1183_v3  ;;  %v1182_v5 = vsub.f32 %v1174_v0, %v1180_v4 }
 0x3ff   :  { %v1185_v6 = vmul.f32 1.442695, %v1182_v5 }
 0x401   :  { %1612 = vpow2.f32 %v1185_v6 }
 0x407   :  { %v1611_v7 = vpop.eup %1610 }
 0x408   :  { %1187 = vadd.xlane.f32.xlu1 %v1611_v7 }
 0x40b   :  { %v1613_v8 = vpop.eup %1612 }
 0x40c   :  { %1189 = vadd.xlane.f32.xlu1 %v1613_v8 }
 0x495   :  { %v1188_v9 = vpop.xlane.xlu1 %1187 }
 0x496   :  { %1614 = vrcp.f32 %v1188_v9 }
 0x499   :  { %v1190_v10 = vpop.xlane.xlu1 %1189 }
 0x49a   :  { %1616 = vrcp.f32 %v1190_v10 }
 0x4a0   :  { %v1615_v11 = vpop.eup %1614 }
 0x4a1   :  { %v1193_v13 = vmul.f32 %v1615_v11, %v1611_v7 }
 0x4a4   :  { %v1617_v12 = vpop.eup %1616 }
 0x4a5   :  { %v1194_v14 = vmul.f32 %v1617_v12, %v1613_v8 }
 0x4a7   :  { %v1356_v15 = vpack.c.bf16 %v1194_v14, %v1193_v13 }
 0x4a9   :  { %1357 = vst [vmem:[#allocation10] sm:$0xff] %v1356_v15  }
 0x4aa   :  { %1717 = shalt.err (!%p1714_p8)
}
 0x4ab   :  { %s1718_s12 = scalar_lea.hbm %s1875_s7, 128 }
 0x4ac   :  { %p1719_p9 = scmp.ne.s32.totalorder %s1875_s7, %s1718_s12  ;;  %p1722_p10 = scmp.lt.u32.totalorder %s1718_s12, %s1875_s7 }
 0x4ae   :  { %p1724_p11 = pnand %p1722_p10, %p1719_p9 }
 0x4b0   :  { %1727 = shalt.err (!%p1724_p11)
}
 0x4b1   :  { %1216 = dma.vmem_to_hbm [thread:$0]  %s1211_s6, 128, %s1875_s7, [#allocation4], %s1743_s0, %s1743_s0, %s1744_s15  }
 0x4b2   :  { %1734 = dma.done.wait [#allocation4], 128  }
 0x4b3   :  { %1735 = vsyncadd [#allocation4], 4294967168 }
 0x4b4   :  { %1220 = vsyncpa [#allocation3], 1 }
 0x4b5   :  { %1221 = vsyncpa [#allocation6], 1 }
 0x4b6   :  { %1222 = vsyncpa [#allocation9], 1 }
 0x4b7   :  { %1223 = vsyncpa [#allocation4], 1 }

</bundles_post_ra>
